<compile_context>
chip_gen: v6e
topology: v6e:2x2x1
jax: 0.10.0
libtpu: 0.0.40
codegen_flags: <defaults>
</compile_context>

<pallas_src>
import functools

import jax
import jax.numpy as jnp
from jax.experimental import pallas as pl
from jax.experimental.pallas import tpu as pltpu


# ----------------------------------------------------------------------------
# Kernel
# ----------------------------------------------------------------------------
def _stack_kernel(*refs):
    """Grid = (row_tiles, col_tiles, K).

    refs = (in_ref_0, ..., in_ref_{K-1}, out_ref); every block is (T, CT).
    At grid step (i, j, kk) copy input kk's (row-tile i, col-tile j) block into
    the matching lane-dense slice of the output slab.  Input block indices
    depend only on (i, j), so Pallas keeps them resident across the innermost
    kk loop; the output block is unique per step and fully overwritten.
    """
    out_ref = refs[-1]
    in_refs = refs[:-1]
    kk = pl.program_id(2)
    for m, in_ref in enumerate(in_refs):

        @pl.when(kk == m)
        def _copy(in_ref=in_ref):
            out_ref[...] = in_ref[...]


# ----------------------------------------------------------------------------
# Tiling heuristics
# ----------------------------------------------------------------------------
def _cdiv(a: int, b: int) -> int:
    return -(-a // b)


def _round_up(x: int, m: int) -> int:
    return _cdiv(x, m) * m


_VMEM_CAP_CACHE = None


def _vmem_capacity_bytes() -> int:
    """Physical VMEM capacity (generation-aware); conservative default if unknown."""
    global _VMEM_CAP_CACHE
    if _VMEM_CAP_CACHE is None:
        cap = None
        try:
            cap = getattr(pltpu.get_tpu_info(), "vmem_capacity_bytes", None)
        except Exception:
            cap = None
        # 64 MiB = smallest per-core VMEM across v5e/v6e/v7x -> safe default.
        _VMEM_CAP_CACHE = int(cap) if cap else 64 * 1024 * 1024
    return _VMEM_CAP_CACHE


def _largest_col_tile(inner: int, max_ct: int):
    """Largest divisor of `inner` that is a multiple of 128 and <= max_ct."""
    if max_ct >= inner:
        return inner
    if max_ct < 128:
        return None
    q = inner // 128          # caller guarantees inner % 128 == 0
    cap = max_ct // 128
    best = 1
    i = 1
    while i * i <= q:
        if q % i == 0:
            for dvs in (i, q // i):
                if best < dvs <= cap:
                    best = dvs
        i += 1
    return 128 * best


def _choose_tiles(outer: int, inner: int, num_in: int, itemsize: int,
                  block_budget: int):
    """Pick (row_tile T, col_tile CT) for the grid, or None -> jnp.stack fallback.

    Budget model (double-buffered): 2 * (K inputs + 1 output) * T * CT * bytes.
    """
    packing = max(1, 4 // itemsize)      # rows packed per 32-bit sublane
    sub = 8 * packing                    # sublane multiple: 8 f32 / 16 bf16 / 32 int8
    t_min = outer if outer < sub else sub
    unit = 2 * (num_in + 1) * itemsize   # bytes per (row x col) element, all buffers

    # Column tile: prefer full `inner`; otherwise the largest 128-multiple
    # divisor that keeps the minimal-T block set within budget (bounds the
    # footprint even for small-outer / huge-inner stacks).
    ct = _largest_col_tile(inner, block_budget // (unit * t_min))
    if ct is None:
        return None

    # Row tile: as large as the budget allows (big per-stream DMAs) ...
    t = (block_budget // (unit * ct)) // sub * sub
    t = max(t, sub)
    # ... but keep enough row tiles for pipelining / megacore sharding.
    min_row_tiles = min(4, _cdiv(outer, sub))
    if min_row_tiles > 1:
        t = min(t, _round_up(_cdiv(outer, min_row_tiles), sub))
    if t >= outer:
        t = outer                        # full-extent block is always legal
    return t, ct


# Below this many output bytes, pallas_call overhead (+ lost XLA fusion)
# dwarfs the <1 us copy on every TPU generation: use jnp.stack.
_SMALL_BYTES_THRESHOLD = 1 * 1024 * 1024


# ----------------------------------------------------------------------------
# Wrapper
# ----------------------------------------------------------------------------
@functools.partial(jax.jit, static_argnames=("dim",))
def stack_pallas(*vecs, dim: int = 2):
    """Pallas equivalent of torch.stack(vecs, dim=dim)."""
    assert len(vecs) >= 1
    base_shape = vecs[0].shape
    dtype = vecs[0].dtype
    for v in vecs:
        assert v.shape == base_shape and v.dtype == dtype

    ndim = len(base_shape)
    # Normalize dim the same way torch.stack does (new axis position).
    d = dim if dim >= 0 else dim + ndim + 1
    assert 0 <= d <= ndim

    num_in = len(vecs)
    outer = 1
    for s in base_shape[:d]:
        outer *= s
    inner = 1
    for s in base_shape[d:]:
        inner *= s

    out_full_shape = base_shape[:d] + (num_in,) + base_shape[d:]
    itemsize = jnp.dtype(dtype).itemsize
    total_out_bytes = num_in * outer * inner * itemsize

    # Generation-aware VMEM budgeting: raise the scoped limit to ~3/4 of the
    # physical capacity (96 MiB on v5e/v6e, 48 MiB on v7x) and let the
    # double-buffered blocks use half of that.
    vmem_cap = _vmem_capacity_bytes()
    vmem_limit = (vmem_cap * 3) // 4
    block_budget = vmem_limit // 2

    use_pallas = (
        itemsize in (1, 2, 4)                     # 64-bit dtypes -> fallback
        and inner % 128 == 0                      # lane-dense, unmasked stores only
        and total_out_bytes > _SMALL_BYTES_THRESHOLD
    )
    tiles = _choose_tiles(outer, inner, num_in, itemsize, block_budget) if use_pallas else None
    if tiles is None:
        # Tiny / lane-unaligned / unbudgetable shapes: XLA's fused copy wins.
        return jnp.stack(vecs, axis=d)

    t, ct = tiles
    cpi = inner // ct                             # column tiles per input
    grid = (_cdiv(outer, t), cpi, num_in)

    # Present each input as a lane-dense (outer, inner) slab.
    slabs = [v.reshape(outer, inner) for v in vecs]

    out_slab = pl.pallas_call(
        _stack_kernel,
        out_shape=jax.ShapeDtypeStruct((outer, num_in * inner), dtype),
        grid=grid,
        in_specs=[
            pl.BlockSpec((t, ct), lambda i, j, kk: (i, j)) for _ in range(num_in)
        ],
        out_specs=pl.BlockSpec((t, ct), lambda i, j, kk: (i, kk * cpi + j)),
        compiler_params=pltpu.CompilerParams(
            # Row/column tiles are independent -> shard across both
            # TensorCores on v7x; the K axis revisits inputs, keep it serial.
            dimension_semantics=("parallel", "parallel", "arbitrary"),
            vmem_limit_bytes=vmem_limit,
        ),
    )(*slabs)

    # (outer, K*inner) row-major == (outer, K, inner) row-major -> direct reshape.
    return out_slab.reshape(out_full_shape)


# ----------------------------------------------------------------------------
# Demo / self-test
# ----------------------------------------------------------------------------
if __name__ == "__main__":
    key = jax.random.PRNGKey(0)
    k1, k2, k3, k4, k5, k6 = jax.random.split(key, 6)

    # Case 1: f32 feature maps, dim=2 (module default) -> Pallas path
    # (outer=16, inner=16384; grid (2, 1, 2): >=4 steps, lane-dense stores).
    x = jax.random.normal(k1, (2, 8, 128, 128), dtype=jnp.float32)
    y = jax.random.normal(k2, (2, 8, 128, 128), dtype=jnp.float32)
    out = jax.block_until_ready(stack_pallas(x, y, dim=2))
    ref = jnp.stack((x, y), axis=2)
    assert out.shape == ref.shape == (2, 8, 2, 128, 128), (out.shape, ref.shape)
    assert jnp.array_equal(out, ref), "mismatch vs jnp.stack (f32 dim=2 path)"

    # Case 2: three inputs stacked at dim=1 (small-outer / large-inner slab)
    # -> Pallas path with full-extent row tile and K=3 dispatch.
    z = jax.random.normal(k3, (2, 8, 128, 128), dtype=jnp.float32)
    out3 = jax.block_until_ready(stack_pallas(x, y, z, dim=1))
    ref3 = jnp.stack((x, y, z), axis=1)
    assert out3.shape == ref3.shape, (out3.shape, ref3.shape)
    assert jnp.array_equal(out3, ref3), "mismatch vs jnp.stack (K=3 dim=1 path)"

    # Case 3: bf16 (exercises dtype-aware sublane tiling, T multiple of 16).
    xb = jax.random.normal(k4, (4, 8, 128, 128), dtype=jnp.bfloat16)
    yb = jax.random.normal(k5, (4, 8, 128, 128), dtype=jnp.bfloat16)
    outb = jax.block_until_ready(stack_pallas(xb, yb, dim=2))
    refb = jnp.stack((xb, yb), axis=2)
    assert outb.shape == refb.shape
    assert jnp.array_equal(outb, refb), "mismatch vs jnp.stack (bf16 path)"

    # Case 4: tiny spec-sized inputs and a last-axis stack -> overhead-dominated
    # and lane-unaligned respectively; both take the jnp.stack fallback on purpose.
    xs = jax.random.normal(k6, (2, 4, 16, 16), dtype=jnp.float32)
    ys = xs + 1.0
    out_s = jax.block_until_ready(stack_pallas(xs, ys, dim=2))
    assert jnp.array_equal(out_s, jnp.stack((xs, ys), axis=2)), "small path mismatch"
    out_l = jax.block_until_ready(stack_pallas(xs, ys, dim=-1))
    assert jnp.array_equal(out_l, jnp.stack((xs, ys), axis=-1)), "dim=-1 path mismatch"

    print("KERNEL_OK")
</pallas_src>

<mosaic_0001>
module attributes {stable_mosaic.version = 11 : i64} {
  func.func @_stack_kernel(%arg0: i32, %arg1: i32, %arg2: i32, %arg3: memref<8x16384xf32, #tpu.memory_space<vmem>>, %arg4: memref<8x16384xf32, #tpu.memory_space<vmem>>, %arg5: memref<8x16384xf32, #tpu.memory_space<vmem>>) attributes {dimension_semantics = [#tpu.dimension_semantics<parallel>, #tpu.dimension_semantics<parallel>, #tpu.dimension_semantics<arbitrary>], iteration_bounds = array<i64: 2, 1, 2>, scalar_prefetch = 0 : i64, scratch_operands = 0 : i64, tpu.core_type = #tpu.core_type<tc>, window_params = [{transform_indices = @transform_0, window_bounds = array<i64: 8, 16384>}, {transform_indices = @transform_1, window_bounds = array<i64: 8, 16384>}, {transform_indices = @transform_2, window_bounds = array<i64: 8, 16384>}]} {
    %c0_i32 = arith.constant 0 : i32
    %0 = arith.cmpi eq, %arg2, %c0_i32 : i32
    %1 = arith.extui %0 : i1 to i32
    %c0_i32_0 = arith.constant 0 : i32
    %2 = arith.cmpi ne, %1, %c0_i32_0 : i32
    scf.if %2 {
      %c0 = arith.constant 0 : index
      %c0_2 = arith.constant 0 : index
      %6 = vector.load %arg3[%c0, %c0_2] : memref<8x16384xf32, #tpu.memory_space<vmem>>, vector<8x16384xf32>
      %c0_3 = arith.constant 0 : index
      %c0_4 = arith.constant 0 : index
      %7 = vector.load %arg5[%c0_3, %c0_4] : memref<8x16384xf32, #tpu.memory_space<vmem>>, vector<8x16384xf32>
      tpu.vector_store %arg5[%c0_3, %c0_4], %6 {strides = array<i32>} : memref<8x16384xf32, #tpu.memory_space<vmem>>, vector<8x16384xf32>,
    } else {
    }
    %c1_i32 = arith.constant 1 : i32
    %3 = arith.cmpi eq, %arg2, %c1_i32 : i32
    %4 = arith.extui %3 : i1 to i32
    %c0_i32_1 = arith.constant 0 : i32
    %5 = arith.cmpi ne, %4, %c0_i32_1 : i32
    scf.if %5 {
      %c0 = arith.constant 0 : index
      %c0_2 = arith.constant 0 : index
      %6 = vector.load %arg4[%c0, %c0_2] : memref<8x16384xf32, #tpu.memory_space<vmem>>, vector<8x16384xf32>
      %c0_3 = arith.constant 0 : index
      %c0_4 = arith.constant 0 : index
      %7 = vector.load %arg5[%c0_3, %c0_4] : memref<8x16384xf32, #tpu.memory_space<vmem>>, vector<8x16384xf32>
      tpu.vector_store %arg5[%c0_3, %c0_4], %6 {strides = array<i32>} : memref<8x16384xf32, #tpu.memory_space<vmem>>, vector<8x16384xf32>,
    } else {
    }
    return
  }
  func.func @transform_0(%arg0: i32, %arg1: i32, %arg2: i32) -> (i32, i32) {
    %c0_i32 = arith.constant 0 : i32
    return %arg0, %arg1 : i32, i32
  }
  func.func @transform_1(%arg0: i32, %arg1: i32, %arg2: i32) -> (i32, i32) {
    %c0_i32 = arith.constant 0 : i32
    return %arg0, %arg1 : i32, i32
  }
  func.func @transform_2(%arg0: i32, %arg1: i32, %arg2: i32) -> (i32, i32) {
    %c1_i32 = arith.constant 1 : i32
    %0 = arith.muli %arg2, %c1_i32 : i32
    %1 = arith.addi %0, %arg1 : i32
    %c0_i32 = arith.constant 0 : i32
    return %arg0, %1 : i32, i32
  }
}

</mosaic_0001>

<bundles_post_ra>
// kernel: stack_pallas.1
= control target key start
LH: loop header
LB: loop body
LE: loop exit
PB: predicated region body
PF: predicated region fallthrough
CT: control target
= control target key end

     0   :  { %s978_s9 = smov 0   ;;  %s980_s10 = smov 0   ;;  %s1555_s0 = inlined_call_operand.vmem [shape: f32[16,16384], index: 0, kind: input, shape index: {}]   ;;  %s1556_s1 = inlined_call_operand.vmem [shape: f32[16,16384], index: 1, kind: input, shape index: {}]   ;;  %s1557_s2 = inlined_call_operand.vmem [shape: f32[16,32768], index: 2, kind: output, shape index: {}]  }
   0x1   :  { %s982_s11 = smov 0   ;;  %s984_s12 = smov 0  }
   0x2   :  { %s986_s13 = smov 0  }
   0x3 LB: > { %s24_s14 = sadd.s32 1, %s953_s11  ;;  %s31_s15 = sadd.s32 1, %s957_s12  ;;  %s961_s13 = sphi %s986_s13, %s12_s13   ;;  %s957_s12 = sphi %s984_s12, %s1561_s12   ;;  %s953_s11 = sphi %s982_s11, %s1560_s11   ;;  %s949_s10 = sphi %s980_s10, %s1559_s10   ;;  %s945_s9 = sphi %s978_s9, %s1558_s9  }
   0x4   : > { %p25_p0 = scmp.ge.s32.totalorder %s24_s14, 2  ;;  %p869_p1 = scmp.ge.s32.totalorder %s961_s13, 1 }
   0x5   : > { %p159_p2 = scmp.lt.s32.totalorder %s961_s13, 5 }
   0x6   : > { %s1563_s14 = smov (%p25_p0, %s24_s14), 0  ;;  %s1565_s15 = smov (!%p25_p0, %s31_s15), %s957_s12 }
   0x7   : > { %p160_p3 = pnand %p869_p1, %p159_p2  ;;  %p33_p4 = scmp.ge.s32.totalorder %s1565_s15, 2 }
   0x8   : > { %p200_p5 = scmp.lt.s32.totalorder (!%p160_p3), %s949_s10, 1  ;;  %s874_s16 = sshll.u32 (!%p160_p3), %s945_s9, 7 }
   0x9   : > { %s1567_s15 = smov (%p33_p4, %s1565_s15), 0  ;;  %163 = sbr.rel (%p160_p3) target bundleno = 159 (0x9f), region = 28 }
   0xa   : > { %p223_p6 = scmp.lt.s32.totalorder (!%p160_p3), %s874_s16, 255  ;;  %p877_p7 = scmp.ne.s32.totalorder (!%p160_p3), %s945_s9, 0 }
   0xe   : > { %s1569_s10 = smov (!%p200_p5, %s949_s10), 1  ;;  %s1571_s16 = smov (!%p223_p6, %s874_s16), 255 }
   0xf   : > { %s881_s17 = sshll.u32 %s1569_s10, 10  ;;  %s875_s18 = sshll.u32 %s1569_s10, 8 }
  0x10   : > { %s1014_s21 = scalar_lea.vmem %s1555_s0, %s881_s17  ;;  %s1019_s24 = scalar_lea.vmem %s1556_s1, %s881_s17 }
  0x11   : > { %s226_s25 = sadd.s32 %s875_s18, %s1571_s16  ;;  %234 = sbr.rel (%p877_p7) target bundleno = 87 (0x57), region = 32 }
  0x12   : > { %s876_s26 = sshll.u32 %s226_s25, 3 }
  0x13   : > { %s1024_s29 = scalar_lea.vmem %s1557_s2, %s876_s26 }
  0x16   : > { %v235_v0 = vld [vmem:[%s1014_s21] sm:$0xff]  ;;  %v236_v1 = vld [vmem:[%s1014_s21 + $0x8] sm:$0xff]  ;;  %v237_v2 = vld [vmem:[%s1014_s21 + $0x10] sm:$0xff] }
  0x17   : > { %363 = vst [vmem:[%s1024_s29] sm:$0xff] %v235_v0  ;;  %364 = vst [vmem:[%s1024_s29 + $0x8] sm:$0xff] %v236_v1  ;;  %v238_v3 = vld [vmem:[%s1014_s21 + $0x18] sm:$0xff]  ;;  %v239_v4 = vld [vmem:[%s1014_s21 + $0x20] sm:$0xff] }
  0x18   : > { %365 = vst [vmem:[%s1024_s29 + $0x10] sm:$0xff] %v237_v2  ;;  %v240_v5 = vld [vmem:[%s1014_s21 + $0x28] sm:$0xff]  ;;  %366 = vst [vmem:[%s1024_s29 + $0x18] sm:$0xff] %v238_v3  ;;  %v241_v6 = vld [vmem:[%s1014_s21 + $0x30] sm:$0xff] }
  0x19   : > { %367 = vst [vmem:[%s1024_s29 + $0x20] sm:$0xff] %v239_v4  ;;  %368 = vst [vmem:[%s1024_s29 + $0x28] sm:$0xff] %v240_v5  ;;  %v242_v7 = vld [vmem:[%s1014_s21 + $0x38] sm:$0xff]  ;;  %v243_v8 = vld [vmem:[%s1014_s21 + $0x40] sm:$0xff] }
  0x1a   : > { %369 = vst [vmem:[%s1024_s29 + $0x30] sm:$0xff] %v241_v6  ;;  %370 = vst [vmem:[%s1024_s29 + $0x38] sm:$0xff] %v242_v7  ;;  %v244_v9 = vld [vmem:[%s1014_s21 + $0x48] sm:$0xff]  ;;  %v245_v10 = vld [vmem:[%s1014_s21 + $0x50] sm:$0xff] }
  0x1b   : > { %371 = vst [vmem:[%s1024_s29 + $0x40] sm:$0xff] %v243_v8  ;;  %v246_v11 = vld [vmem:[%s1014_s21 + $0x58] sm:$0xff]  ;;  %372 = vst [vmem:[%s1024_s29 + $0x48] sm:$0xff] %v244_v9  ;;  %v247_v12 = vld [vmem:[%s1014_s21 + $0x60] sm:$0xff] }
  0x1c   : > { %373 = vst [vmem:[%s1024_s29 + $0x50] sm:$0xff] %v245_v10  ;;  %374 = vst [vmem:[%s1024_s29 + $0x58] sm:$0xff] %v246_v11  ;;  %v248_v13 = vld [vmem:[%s1014_s21 + $0x68] sm:$0xff]  ;;  %v249_v14 = vld [vmem:[%s1014_s21 + $0x70] sm:$0xff] }
  0x1d   : > { %375 = vst [vmem:[%s1024_s29 + $0x60] sm:$0xff] %v247_v12  ;;  %376 = vst [vmem:[%s1024_s29 + $0x68] sm:$0xff] %v248_v13  ;;  %v250_v15 = vld [vmem:[%s1014_s21 + $0x78] sm:$0xff]  ;;  %v251_v16 = vld [vmem:[%s1014_s21 + $0x80] sm:$0xff] }
  0x1e   : > { %377 = vst [vmem:[%s1024_s29 + $0x70] sm:$0xff] %v249_v14  ;;  %v252_v17 = vld [vmem:[%s1014_s21 + $0x88] sm:$0xff]  ;;  %378 = vst [vmem:[%s1024_s29 + $0x78] sm:$0xff] %v250_v15  ;;  %v253_v18 = vld [vmem:[%s1014_s21 + $0x90] sm:$0xff] }
  0x1f   : > { %379 = vst [vmem:[%s1024_s29 + $0x80] sm:$0xff] %v251_v16  ;;  %380 = vst [vmem:[%s1024_s29 + $0x88] sm:$0xff] %v252_v17  ;;  %v254_v19 = vld [vmem:[%s1014_s21 + $0x98] sm:$0xff]  ;;  %v255_v20 = vld [vmem:[%s1014_s21 + $0xa0] sm:$0xff] }
  0x20   : > { %381 = vst [vmem:[%s1024_s29 + $0x90] sm:$0xff] %v253_v18  ;;  %382 = vst [vmem:[%s1024_s29 + $0x98] sm:$0xff] %v254_v19  ;;  %v256_v21 = vld [vmem:[%s1014_s21 + $0xa8] sm:$0xff]  ;;  %v257_v22 = vld [vmem:[%s1014_s21 + $0xb0] sm:$0xff] }
  0x21   : > { %383 = vst [vmem:[%s1024_s29 + $0xa0] sm:$0xff] %v255_v20  ;;  %v258_v23 = vld [vmem:[%s1014_s21 + $0xb8] sm:$0xff]  ;;  %384 = vst [vmem:[%s1024_s29 + $0xa8] sm:$0xff] %v256_v21  ;;  %v259_v24 = vld [vmem:[%s1014_s21 + $0xc0] sm:$0xff] }
  0x22   : > { %385 = vst [vmem:[%s1024_s29 + $0xb0] sm:$0xff] %v257_v22  ;;  %386 = vst [vmem:[%s1024_s29 + $0xb8] sm:$0xff] %v258_v23  ;;  %v260_v25 = vld [vmem:[%s1014_s21 + $0xc8] sm:$0xff]  ;;  %v261_v26 = vld [vmem:[%s1014_s21 + $0xd0] sm:$0xff] }
  0x23   : > { %387 = vst [vmem:[%s1024_s29 + $0xc0] sm:$0xff] %v259_v24  ;;  %388 = vst [vmem:[%s1024_s29 + $0xc8] sm:$0xff] %v260_v25  ;;  %v262_v27 = vld [vmem:[%s1014_s21 + $0xd8] sm:$0xff]  ;;  %v263_v28 = vld [vmem:[%s1014_s21 + $0xe0] sm:$0xff] }
  0x24   : > { %389 = vst [vmem:[%s1024_s29 + $0xd0] sm:$0xff] %v261_v26  ;;  %v264_v29 = vld [vmem:[%s1014_s21 + $0xe8] sm:$0xff]  ;;  %390 = vst [vmem:[%s1024_s29 + $0xd8] sm:$0xff] %v262_v27  ;;  %v265_v30 = vld [vmem:[%s1014_s21 + $0xf0] sm:$0xff] }
  0x25   : > { %391 = vst [vmem:[%s1024_s29 + $0xe0] sm:$0xff] %v263_v28  ;;  %392 = vst [vmem:[%s1024_s29 + $0xe8] sm:$0xff] %v264_v29  ;;  %v266_v31 = vld [vmem:[%s1014_s21 + $0xf8] sm:$0xff]  ;;  %v267_v32 = vld [vmem:[%s1014_s21 + $0x100] sm:$0xff] }
  0x26   : > { %393 = vst [vmem:[%s1024_s29 + $0xf0] sm:$0xff] %v265_v30  ;;  %394 = vst [vmem:[%s1024_s29 + $0xf8] sm:$0xff] %v266_v31  ;;  %v268_v33 = vld [vmem:[%s1014_s21 + $0x108] sm:$0xff]  ;;  %v269_v34 = vld [vmem:[%s1014_s21 + $0x110] sm:$0xff] }
  0x27   : > { %395 = vst [vmem:[%s1024_s29 + $0x100] sm:$0xff] %v267_v32  ;;  %v270_v35 = vld [vmem:[%s1014_s21 + $0x118] sm:$0xff]  ;;  %396 = vst [vmem:[%s1024_s29 + $0x108] sm:$0xff] %v268_v33  ;;  %v271_v36 = vld [vmem:[%s1014_s21 + $0x120] sm:$0xff] }
  0x28   : > { %397 = vst [vmem:[%s1024_s29 + $0x110] sm:$0xff] %v269_v34  ;;  %398 = vst [vmem:[%s1024_s29 + $0x118] sm:$0xff] %v270_v35  ;;  %v272_v37 = vld [vmem:[%s1014_s21 + $0x128] sm:$0xff]  ;;  %v273_v38 = vld [vmem:[%s1014_s21 + $0x130] sm:$0xff] }
  0x29   : > { %399 = vst [vmem:[%s1024_s29 + $0x120] sm:$0xff] %v271_v36  ;;  %400 = vst [vmem:[%s1024_s29 + $0x128] sm:$0xff] %v272_v37  ;;  %v274_v39 = vld [vmem:[%s1014_s21 + $0x138] sm:$0xff]  ;;  %v275_v40 = vld [vmem:[%s1014_s21 + $0x140] sm:$0xff] }
  0x2a   : > { %401 = vst [vmem:[%s1024_s29 + $0x130] sm:$0xff] %v273_v38  ;;  %v276_v41 = vld [vmem:[%s1014_s21 + $0x148] sm:$0xff]  ;;  %402 = vst [vmem:[%s1024_s29 + $0x138] sm:$0xff] %v274_v39  ;;  %v277_v42 = vld [vmem:[%s1014_s21 + $0x150] sm:$0xff] }
  0x2b   : > { %403 = vst [vmem:[%s1024_s29 + $0x140] sm:$0xff] %v275_v40  ;;  %404 = vst [vmem:[%s1024_s29 + $0x148] sm:$0xff] %v276_v41  ;;  %v278_v43 = vld [vmem:[%s1014_s21 + $0x158] sm:$0xff]  ;;  %v279_v44 = vld [vmem:[%s1014_s21 + $0x160] sm:$0xff] }
  0x2c   : > { %405 = vst [vmem:[%s1024_s29 + $0x150] sm:$0xff] %v277_v42  ;;  %406 = vst [vmem:[%s1024_s29 + $0x158] sm:$0xff] %v278_v43  ;;  %v280_v45 = vld [vmem:[%s1014_s21 + $0x168] sm:$0xff]  ;;  %v281_v46 = vld [vmem:[%s1014_s21 + $0x170] sm:$0xff] }
  0x2d   : > { %407 = vst [vmem:[%s1024_s29 + $0x160] sm:$0xff] %v279_v44  ;;  %v282_v47 = vld [vmem:[%s1014_s21 + $0x178] sm:$0xff]  ;;  %408 = vst [vmem:[%s1024_s29 + $0x168] sm:$0xff] %v280_v45  ;;  %v283_v48 = vld [vmem:[%s1014_s21 + $0x180] sm:$0xff] }
  0x2e   : > { %409 = vst [vmem:[%s1024_s29 + $0x170] sm:$0xff] %v281_v46  ;;  %410 = vst [vmem:[%s1024_s29 + $0x178] sm:$0xff] %v282_v47  ;;  %v284_v49 = vld [vmem:[%s1014_s21 + $0x188] sm:$0xff]  ;;  %v285_v50 = vld [vmem:[%s1014_s21 + $0x190] sm:$0xff] }
  0x2f   : > { %411 = vst [vmem:[%s1024_s29 + $0x180] sm:$0xff] %v283_v48  ;;  %412 = vst [vmem:[%s1024_s29 + $0x188] sm:$0xff] %v284_v49  ;;  %v286_v51 = vld [vmem:[%s1014_s21 + $0x198] sm:$0xff]  ;;  %v287_v52 = vld [vmem:[%s1014_s21 + $0x1a0] sm:$0xff] }
  0x30   : > { %413 = vst [vmem:[%s1024_s29 + $0x190] sm:$0xff] %v285_v50  ;;  %v288_v53 = vld [vmem:[%s1014_s21 + $0x1a8] sm:$0xff]  ;;  %414 = vst [vmem:[%s1024_s29 + $0x198] sm:$0xff] %v286_v51  ;;  %v289_v54 = vld [vmem:[%s1014_s21 + $0x1b0] sm:$0xff] }
  0x31   : > { %415 = vst [vmem:[%s1024_s29 + $0x1a0] sm:$0xff] %v287_v52  ;;  %416 = vst [vmem:[%s1024_s29 + $0x1a8] sm:$0xff] %v288_v53  ;;  %v290_v55 = vld [vmem:[%s1014_s21 + $0x1b8] sm:$0xff]  ;;  %v291_v56 = vld [vmem:[%s1014_s21 + $0x1c0] sm:$0xff] }
  0x32   : > { %417 = vst [vmem:[%s1024_s29 + $0x1b0] sm:$0xff] %v289_v54  ;;  %418 = vst [vmem:[%s1024_s29 + $0x1b8] sm:$0xff] %v290_v55  ;;  %v292_v57 = vld [vmem:[%s1014_s21 + $0x1c8] sm:$0xff]  ;;  %v293_v58 = vld [vmem:[%s1014_s21 + $0x1d0] sm:$0xff] }
  0x33   : > { %419 = vst [vmem:[%s1024_s29 + $0x1c0] sm:$0xff] %v291_v56  ;;  %v294_v59 = vld [vmem:[%s1014_s21 + $0x1d8] sm:$0xff]  ;;  %420 = vst [vmem:[%s1024_s29 + $0x1c8] sm:$0xff] %v292_v57  ;;  %v295_v60 = vld [vmem:[%s1014_s21 + $0x1e0] sm:$0xff] }
  0x34   : > { %421 = vst [vmem:[%s1024_s29 + $0x1d0] sm:$0xff] %v293_v58  ;;  %422 = vst [vmem:[%s1024_s29 + $0x1d8] sm:$0xff] %v294_v59  ;;  %v296_v61 = vld [vmem:[%s1014_s21 + $0x1e8] sm:$0xff]  ;;  %v297_v62 = vld [vmem:[%s1014_s21 + $0x1f0] sm:$0xff] }
  0x35   : > { %423 = vst [vmem:[%s1024_s29 + $0x1e0] sm:$0xff] %v295_v60  ;;  %424 = vst [vmem:[%s1024_s29 + $0x1e8] sm:$0xff] %v296_v61  ;;  %v298_v63 = vld [vmem:[%s1014_s21 + $0x1f8] sm:$0xff]  ;;  %v299_v0 = vld [vmem:[%s1014_s21 + $0x200] sm:$0xff] }
  0x36   : > { %425 = vst [vmem:[%s1024_s29 + $0x1f0] sm:$0xff] %v297_v62  ;;  %v300_v1 = vld [vmem:[%s1014_s21 + $0x208] sm:$0xff]  ;;  %426 = vst [vmem:[%s1024_s29 + $0x1f8] sm:$0xff] %v298_v63  ;;  %v301_v2 = vld [vmem:[%s1014_s21 + $0x210] sm:$0xff] }
  0x37   : > { %427 = vst [vmem:[%s1024_s29 + $0x200] sm:$0xff] %v299_v0  ;;  %428 = vst [vmem:[%s1024_s29 + $0x208] sm:$0xff] %v300_v1  ;;  %v302_v3 = vld [vmem:[%s1014_s21 + $0x218] sm:$0xff]  ;;  %v303_v4 = vld [vmem:[%s1014_s21 + $0x220] sm:$0xff] }
  0x38   : > { %429 = vst [vmem:[%s1024_s29 + $0x210] sm:$0xff] %v301_v2  ;;  %430 = vst [vmem:[%s1024_s29 + $0x218] sm:$0xff] %v302_v3  ;;  %v304_v5 = vld [vmem:[%s1014_s21 + $0x228] sm:$0xff]  ;;  %v305_v6 = vld [vmem:[%s1014_s21 + $0x230] sm:$0xff] }
  0x39   : > { %431 = vst [vmem:[%s1024_s29 + $0x220] sm:$0xff] %v303_v4  ;;  %v306_v7 = vld [vmem:[%s1014_s21 + $0x238] sm:$0xff]  ;;  %432 = vst [vmem:[%s1024_s29 + $0x228] sm:$0xff] %v304_v5  ;;  %v307_v8 = vld [vmem:[%s1014_s21 + $0x240] sm:$0xff] }
  0x3a   : > { %433 = vst [vmem:[%s1024_s29 + $0x230] sm:$0xff] %v305_v6  ;;  %434 = vst [vmem:[%s1024_s29 + $0x238] sm:$0xff] %v306_v7  ;;  %v308_v9 = vld [vmem:[%s1014_s21 + $0x248] sm:$0xff]  ;;  %v309_v10 = vld [vmem:[%s1014_s21 + $0x250] sm:$0xff] }
  0x3b   : > { %435 = vst [vmem:[%s1024_s29 + $0x240] sm:$0xff] %v307_v8  ;;  %436 = vst [vmem:[%s1024_s29 + $0x248] sm:$0xff] %v308_v9  ;;  %v310_v11 = vld [vmem:[%s1014_s21 + $0x258] sm:$0xff]  ;;  %v311_v12 = vld [vmem:[%s1014_s21 + $0x260] sm:$0xff] }
  0x3c   : > { %437 = vst [vmem:[%s1024_s29 + $0x250] sm:$0xff] %v309_v10  ;;  %v312_v13 = vld [vmem:[%s1014_s21 + $0x268] sm:$0xff]  ;;  %438 = vst [vmem:[%s1024_s29 + $0x258] sm:$0xff] %v310_v11  ;;  %v313_v14 = vld [vmem:[%s1014_s21 + $0x270] sm:$0xff] }
  0x3d   : > { %439 = vst [vmem:[%s1024_s29 + $0x260] sm:$0xff] %v311_v12  ;;  %440 = vst [vmem:[%s1024_s29 + $0x268] sm:$0xff] %v312_v13  ;;  %v314_v15 = vld [vmem:[%s1014_s21 + $0x278] sm:$0xff]  ;;  %v315_v16 = vld [vmem:[%s1014_s21 + $0x280] sm:$0xff] }
  0x3e   : > { %441 = vst [vmem:[%s1024_s29 + $0x270] sm:$0xff] %v313_v14  ;;  %442 = vst [vmem:[%s1024_s29 + $0x278] sm:$0xff] %v314_v15  ;;  %v316_v17 = vld [vmem:[%s1014_s21 + $0x288] sm:$0xff]  ;;  %v317_v18 = vld [vmem:[%s1014_s21 + $0x290] sm:$0xff] }
  0x3f   : > { %443 = vst [vmem:[%s1024_s29 + $0x280] sm:$0xff] %v315_v16  ;;  %v318_v19 = vld [vmem:[%s1014_s21 + $0x298] sm:$0xff]  ;;  %444 = vst [vmem:[%s1024_s29 + $0x288] sm:$0xff] %v316_v17  ;;  %v319_v20 = vld [vmem:[%s1014_s21 + $0x2a0] sm:$0xff] }
  0x40   : > { %445 = vst [vmem:[%s1024_s29 + $0x290] sm:$0xff] %v317_v18  ;;  %446 = vst [vmem:[%s1024_s29 + $0x298] sm:$0xff] %v318_v19  ;;  %v320_v21 = vld [vmem:[%s1014_s21 + $0x2a8] sm:$0xff]  ;;  %v321_v22 = vld [vmem:[%s1014_s21 + $0x2b0] sm:$0xff] }
  0x41   : > { %447 = vst [vmem:[%s1024_s29 + $0x2a0] sm:$0xff] %v319_v20  ;;  %448 = vst [vmem:[%s1024_s29 + $0x2a8] sm:$0xff] %v320_v21  ;;  %v322_v23 = vld [vmem:[%s1014_s21 + $0x2b8] sm:$0xff]  ;;  %v323_v24 = vld [vmem:[%s1014_s21 + $0x2c0] sm:$0xff] }
  0x42   : > { %449 = vst [vmem:[%s1024_s29 + $0x2b0] sm:$0xff] %v321_v22  ;;  %v324_v25 = vld [vmem:[%s1014_s21 + $0x2c8] sm:$0xff]  ;;  %450 = vst [vmem:[%s1024_s29 + $0x2b8] sm:$0xff] %v322_v23  ;;  %v325_v26 = vld [vmem:[%s1014_s21 + $0x2d0] sm:$0xff] }
  0x43   : > { %451 = vst [vmem:[%s1024_s29 + $0x2c0] sm:$0xff] %v323_v24  ;;  %452 = vst [vmem:[%s1024_s29 + $0x2c8] sm:$0xff] %v324_v25  ;;  %v326_v27 = vld [vmem:[%s1014_s21 + $0x2d8] sm:$0xff]  ;;  %v327_v28 = vld [vmem:[%s1014_s21 + $0x2e0] sm:$0xff] }
  0x44   : > { %453 = vst [vmem:[%s1024_s29 + $0x2d0] sm:$0xff] %v325_v26  ;;  %454 = vst [vmem:[%s1024_s29 + $0x2d8] sm:$0xff] %v326_v27  ;;  %v328_v29 = vld [vmem:[%s1014_s21 + $0x2e8] sm:$0xff]  ;;  %v329_v30 = vld [vmem:[%s1014_s21 + $0x2f0] sm:$0xff] }
  0x45   : > { %455 = vst [vmem:[%s1024_s29 + $0x2e0] sm:$0xff] %v327_v28  ;;  %v330_v31 = vld [vmem:[%s1014_s21 + $0x2f8] sm:$0xff]  ;;  %456 = vst [vmem:[%s1024_s29 + $0x2e8] sm:$0xff] %v328_v29  ;;  %v331_v32 = vld [vmem:[%s1014_s21 + $0x300] sm:$0xff] }
  0x46   : > { %457 = vst [vmem:[%s1024_s29 + $0x2f0] sm:$0xff] %v329_v30  ;;  %458 = vst [vmem:[%s1024_s29 + $0x2f8] sm:$0xff] %v330_v31  ;;  %v332_v33 = vld [vmem:[%s1014_s21 + $0x308] sm:$0xff]  ;;  %v333_v34 = vld [vmem:[%s1014_s21 + $0x310] sm:$0xff] }
  0x47   : > { %459 = vst [vmem:[%s1024_s29 + $0x300] sm:$0xff] %v331_v32  ;;  %460 = vst [vmem:[%s1024_s29 + $0x308] sm:$0xff] %v332_v33  ;;  %v334_v35 = vld [vmem:[%s1014_s21 + $0x318] sm:$0xff]  ;;  %v335_v36 = vld [vmem:[%s1014_s21 + $0x320] sm:$0xff] }
  0x48   : > { %461 = vst [vmem:[%s1024_s29 + $0x310] sm:$0xff] %v333_v34  ;;  %v336_v37 = vld [vmem:[%s1014_s21 + $0x328] sm:$0xff]  ;;  %462 = vst [vmem:[%s1024_s29 + $0x318] sm:$0xff] %v334_v35  ;;  %v337_v38 = vld [vmem:[%s1014_s21 + $0x330] sm:$0xff] }
  0x49   : > { %463 = vst [vmem:[%s1024_s29 + $0x320] sm:$0xff] %v335_v36  ;;  %464 = vst [vmem:[%s1024_s29 + $0x328] sm:$0xff] %v336_v37  ;;  %v338_v39 = vld [vmem:[%s1014_s21 + $0x338] sm:$0xff]  ;;  %v339_v40 = vld [vmem:[%s1014_s21 + $0x340] sm:$0xff] }
  0x4a   : > { %465 = vst [vmem:[%s1024_s29 + $0x330] sm:$0xff] %v337_v38  ;;  %466 = vst [vmem:[%s1024_s29 + $0x338] sm:$0xff] %v338_v39  ;;  %v340_v41 = vld [vmem:[%s1014_s21 + $0x348] sm:$0xff]  ;;  %v341_v42 = vld [vmem:[%s1014_s21 + $0x350] sm:$0xff] }
  0x4b   : > { %467 = vst [vmem:[%s1024_s29 + $0x340] sm:$0xff] %v339_v40  ;;  %v342_v43 = vld [vmem:[%s1014_s21 + $0x358] sm:$0xff]  ;;  %468 = vst [vmem:[%s1024_s29 + $0x348] sm:$0xff] %v340_v41  ;;  %v343_v44 = vld [vmem:[%s1014_s21 + $0x360] sm:$0xff] }
  0x4c   : > { %469 = vst [vmem:[%s1024_s29 + $0x350] sm:$0xff] %v341_v42  ;;  %470 = vst [vmem:[%s1024_s29 + $0x358] sm:$0xff] %v342_v43  ;;  %v344_v45 = vld [vmem:[%s1014_s21 + $0x368] sm:$0xff]  ;;  %v345_v46 = vld [vmem:[%s1014_s21 + $0x370] sm:$0xff] }
  0x4d   : > { %471 = vst [vmem:[%s1024_s29 + $0x360] sm:$0xff] %v343_v44  ;;  %472 = vst [vmem:[%s1024_s29 + $0x368] sm:$0xff] %v344_v45  ;;  %v346_v47 = vld [vmem:[%s1014_s21 + $0x378] sm:$0xff]  ;;  %v347_v48 = vld [vmem:[%s1014_s21 + $0x380] sm:$0xff] }
  0x4e   : > { %473 = vst [vmem:[%s1024_s29 + $0x370] sm:$0xff] %v345_v46  ;;  %v348_v49 = vld [vmem:[%s1014_s21 + $0x388] sm:$0xff]  ;;  %474 = vst [vmem:[%s1024_s29 + $0x378] sm:$0xff] %v346_v47  ;;  %v349_v50 = vld [vmem:[%s1014_s21 + $0x390] sm:$0xff] }
  0x4f   : > { %475 = vst [vmem:[%s1024_s29 + $0x380] sm:$0xff] %v347_v48  ;;  %476 = vst [vmem:[%s1024_s29 + $0x388] sm:$0xff] %v348_v49  ;;  %v350_v51 = vld [vmem:[%s1014_s21 + $0x398] sm:$0xff]  ;;  %v351_v52 = vld [vmem:[%s1014_s21 + $0x3a0] sm:$0xff] }
  0x50   : > { %477 = vst [vmem:[%s1024_s29 + $0x390] sm:$0xff] %v349_v50  ;;  %478 = vst [vmem:[%s1024_s29 + $0x398] sm:$0xff] %v350_v51  ;;  %v352_v53 = vld [vmem:[%s1014_s21 + $0x3a8] sm:$0xff]  ;;  %v353_v54 = vld [vmem:[%s1014_s21 + $0x3b0] sm:$0xff] }
  0x51   : > { %479 = vst [vmem:[%s1024_s29 + $0x3a0] sm:$0xff] %v351_v52  ;;  %v354_v55 = vld [vmem:[%s1014_s21 + $0x3b8] sm:$0xff]  ;;  %480 = vst [vmem:[%s1024_s29 + $0x3a8] sm:$0xff] %v352_v53  ;;  %v355_v56 = vld [vmem:[%s1014_s21 + $0x3c0] sm:$0xff] }
  0x52   : > { %481 = vst [vmem:[%s1024_s29 + $0x3b0] sm:$0xff] %v353_v54  ;;  %482 = vst [vmem:[%s1024_s29 + $0x3b8] sm:$0xff] %v354_v55  ;;  %v356_v57 = vld [vmem:[%s1014_s21 + $0x3c8] sm:$0xff]  ;;  %v357_v58 = vld [vmem:[%s1014_s21 + $0x3d0] sm:$0xff] }
  0x53   : > { %483 = vst [vmem:[%s1024_s29 + $0x3c0] sm:$0xff] %v355_v56  ;;  %484 = vst [vmem:[%s1024_s29 + $0x3c8] sm:$0xff] %v356_v57  ;;  %v358_v59 = vld [vmem:[%s1014_s21 + $0x3d8] sm:$0xff]  ;;  %v359_v60 = vld [vmem:[%s1014_s21 + $0x3e0] sm:$0xff] }
  0x54   : > { %485 = vst [vmem:[%s1024_s29 + $0x3d0] sm:$0xff] %v357_v58  ;;  %v360_v61 = vld [vmem:[%s1014_s21 + $0x3e8] sm:$0xff]  ;;  %486 = vst [vmem:[%s1024_s29 + $0x3d8] sm:$0xff] %v358_v59  ;;  %v361_v62 = vld [vmem:[%s1014_s21 + $0x3f0] sm:$0xff] }
  0x55   : > { %487 = vst [vmem:[%s1024_s29 + $0x3e0] sm:$0xff] %v359_v60  ;;  %488 = vst [vmem:[%s1024_s29 + $0x3e8] sm:$0xff] %v360_v61  ;;  %v362_v63 = vld [vmem:[%s1014_s21 + $0x3f8] sm:$0xff] }
  0x56   : > { %489 = vst [vmem:[%s1024_s29 + $0x3f0] sm:$0xff] %v361_v62  ;;  %490 = vst [vmem:[%s1024_s29 + $0x3f8] sm:$0xff] %v362_v63 }
  0x57 PF: > { %p878_p8 = scmp.ne.s32.totalorder %s945_s9, 1 }
  0x59   : > { %494 = sbr.rel (%p878_p8) target bundleno = 159 (0x9f), region = 36 }
  0x5e   : > { %v495_v0 = vld [vmem:[%s1019_s24] sm:$0xff]  ;;  %v496_v1 = vld [vmem:[%s1019_s24 + $0x8] sm:$0xff]  ;;  %v497_v2 = vld [vmem:[%s1019_s24 + $0x10] sm:$0xff] }
  0x5f   : > { %623 = vst [vmem:[%s1024_s29] sm:$0xff] %v495_v0  ;;  %624 = vst [vmem:[%s1024_s29 + $0x8] sm:$0xff] %v496_v1  ;;  %v498_v3 = vld [vmem:[%s1019_s24 + $0x18] sm:$0xff]  ;;  %v499_v4 = vld [vmem:[%s1019_s24 + $0x20] sm:$0xff] }
  0x60   : > { %625 = vst [vmem:[%s1024_s29 + $0x10] sm:$0xff] %v497_v2  ;;  %v500_v5 = vld [vmem:[%s1019_s24 + $0x28] sm:$0xff]  ;;  %626 = vst [vmem:[%s1024_s29 + $0x18] sm:$0xff] %v498_v3  ;;  %v501_v6 = vld [vmem:[%s1019_s24 + $0x30] sm:$0xff] }
  0x61   : > { %627 = vst [vmem:[%s1024_s29 + $0x20] sm:$0xff] %v499_v4  ;;  %628 = vst [vmem:[%s1024_s29 + $0x28] sm:$0xff] %v500_v5  ;;  %v502_v7 = vld [vmem:[%s1019_s24 + $0x38] sm:$0xff]  ;;  %v503_v8 = vld [vmem:[%s1019_s24 + $0x40] sm:$0xff] }
  0x62   : > { %629 = vst [vmem:[%s1024_s29 + $0x30] sm:$0xff] %v501_v6  ;;  %630 = vst [vmem:[%s1024_s29 + $0x38] sm:$0xff] %v502_v7  ;;  %v504_v9 = vld [vmem:[%s1019_s24 + $0x48] sm:$0xff]  ;;  %v505_v10 = vld [vmem:[%s1019_s24 + $0x50] sm:$0xff] }
  0x63   : > { %631 = vst [vmem:[%s1024_s29 + $0x40] sm:$0xff] %v503_v8  ;;  %v506_v11 = vld [vmem:[%s1019_s24 + $0x58] sm:$0xff]  ;;  %632 = vst [vmem:[%s1024_s29 + $0x48] sm:$0xff] %v504_v9  ;;  %v507_v12 = vld [vmem:[%s1019_s24 + $0x60] sm:$0xff] }
  0x64   : > { %633 = vst [vmem:[%s1024_s29 + $0x50] sm:$0xff] %v505_v10  ;;  %634 = vst [vmem:[%s1024_s29 + $0x58] sm:$0xff] %v506_v11  ;;  %v508_v13 = vld [vmem:[%s1019_s24 + $0x68] sm:$0xff]  ;;  %v509_v14 = vld [vmem:[%s1019_s24 + $0x70] sm:$0xff] }
  0x65   : > { %635 = vst [vmem:[%s1024_s29 + $0x60] sm:$0xff] %v507_v12  ;;  %636 = vst [vmem:[%s1024_s29 + $0x68] sm:$0xff] %v508_v13  ;;  %v510_v15 = vld [vmem:[%s1019_s24 + $0x78] sm:$0xff]  ;;  %v511_v16 = vld [vmem:[%s1019_s24 + $0x80] sm:$0xff] }
  0x66   : > { %637 = vst [vmem:[%s1024_s29 + $0x70] sm:$0xff] %v509_v14  ;;  %v512_v17 = vld [vmem:[%s1019_s24 + $0x88] sm:$0xff]  ;;  %638 = vst [vmem:[%s1024_s29 + $0x78] sm:$0xff] %v510_v15  ;;  %v513_v18 = vld [vmem:[%s1019_s24 + $0x90] sm:$0xff] }
  0x67   : > { %639 = vst [vmem:[%s1024_s29 + $0x80] sm:$0xff] %v511_v16  ;;  %640 = vst [vmem:[%s1024_s29 + $0x88] sm:$0xff] %v512_v17  ;;  %v514_v19 = vld [vmem:[%s1019_s24 + $0x98] sm:$0xff]  ;;  %v515_v20 = vld [vmem:[%s1019_s24 + $0xa0] sm:$0xff] }
  0x68   : > { %641 = vst [vmem:[%s1024_s29 + $0x90] sm:$0xff] %v513_v18  ;;  %642 = vst [vmem:[%s1024_s29 + $0x98] sm:$0xff] %v514_v19  ;;  %v516_v21 = vld [vmem:[%s1019_s24 + $0xa8] sm:$0xff]  ;;  %v517_v22 = vld [vmem:[%s1019_s24 + $0xb0] sm:$0xff] }
  0x69   : > { %643 = vst [vmem:[%s1024_s29 + $0xa0] sm:$0xff] %v515_v20  ;;  %v518_v23 = vld [vmem:[%s1019_s24 + $0xb8] sm:$0xff]  ;;  %644 = vst [vmem:[%s1024_s29 + $0xa8] sm:$0xff] %v516_v21  ;;  %v519_v24 = vld [vmem:[%s1019_s24 + $0xc0] sm:$0xff] }
  0x6a   : > { %645 = vst [vmem:[%s1024_s29 + $0xb0] sm:$0xff] %v517_v22  ;;  %646 = vst [vmem:[%s1024_s29 + $0xb8] sm:$0xff] %v518_v23  ;;  %v520_v25 = vld [vmem:[%s1019_s24 + $0xc8] sm:$0xff]  ;;  %v521_v26 = vld [vmem:[%s1019_s24 + $0xd0] sm:$0xff] }
  0x6b   : > { %647 = vst [vmem:[%s1024_s29 + $0xc0] sm:$0xff] %v519_v24  ;;  %648 = vst [vmem:[%s1024_s29 + $0xc8] sm:$0xff] %v520_v25  ;;  %v522_v27 = vld [vmem:[%s1019_s24 + $0xd8] sm:$0xff]  ;;  %v523_v28 = vld [vmem:[%s1019_s24 + $0xe0] sm:$0xff] }
  0x6c   : > { %649 = vst [vmem:[%s1024_s29 + $0xd0] sm:$0xff] %v521_v26  ;;  %v524_v29 = vld [vmem:[%s1019_s24 + $0xe8] sm:$0xff]  ;;  %650 = vst [vmem:[%s1024_s29 + $0xd8] sm:$0xff] %v522_v27  ;;  %v525_v30 = vld [vmem:[%s1019_s24 + $0xf0] sm:$0xff] }
  0x6d   : > { %651 = vst [vmem:[%s1024_s29 + $0xe0] sm:$0xff] %v523_v28  ;;  %652 = vst [vmem:[%s1024_s29 + $0xe8] sm:$0xff] %v524_v29  ;;  %v526_v31 = vld [vmem:[%s1019_s24 + $0xf8] sm:$0xff]  ;;  %v527_v32 = vld [vmem:[%s1019_s24 + $0x100] sm:$0xff] }
  0x6e   : > { %653 = vst [vmem:[%s1024_s29 + $0xf0] sm:$0xff] %v525_v30  ;;  %654 = vst [vmem:[%s1024_s29 + $0xf8] sm:$0xff] %v526_v31  ;;  %v528_v33 = vld [vmem:[%s1019_s24 + $0x108] sm:$0xff]  ;;  %v529_v34 = vld [vmem:[%s1019_s24 + $0x110] sm:$0xff] }
  0x6f   : > { %655 = vst [vmem:[%s1024_s29 + $0x100] sm:$0xff] %v527_v32  ;;  %v530_v35 = vld [vmem:[%s1019_s24 + $0x118] sm:$0xff]  ;;  %656 = vst [vmem:[%s1024_s29 + $0x108] sm:$0xff] %v528_v33  ;;  %v531_v36 = vld [vmem:[%s1019_s24 + $0x120] sm:$0xff] }
  0x70   : > { %657 = vst [vmem:[%s1024_s29 + $0x110] sm:$0xff] %v529_v34  ;;  %658 = vst [vmem:[%s1024_s29 + $0x118] sm:$0xff] %v530_v35  ;;  %v532_v37 = vld [vmem:[%s1019_s24 + $0x128] sm:$0xff]  ;;  %v533_v38 = vld [vmem:[%s1019_s24 + $0x130] sm:$0xff] }
  0x71   : > { %659 = vst [vmem:[%s1024_s29 + $0x120] sm:$0xff] %v531_v36  ;;  %660 = vst [vmem:[%s1024_s29 + $0x128] sm:$0xff] %v532_v37  ;;  %v534_v39 = vld [vmem:[%s1019_s24 + $0x138] sm:$0xff]  ;;  %v535_v40 = vld [vmem:[%s1019_s24 + $0x140] sm:$0xff] }
  0x72   : > { %661 = vst [vmem:[%s1024_s29 + $0x130] sm:$0xff] %v533_v38  ;;  %v536_v41 = vld [vmem:[%s1019_s24 + $0x148] sm:$0xff]  ;;  %662 = vst [vmem:[%s1024_s29 + $0x138] sm:$0xff] %v534_v39  ;;  %v537_v42 = vld [vmem:[%s1019_s24 + $0x150] sm:$0xff] }
  0x73   : > { %663 = vst [vmem:[%s1024_s29 + $0x140] sm:$0xff] %v535_v40  ;;  %664 = vst [vmem:[%s1024_s29 + $0x148] sm:$0xff] %v536_v41  ;;  %v538_v43 = vld [vmem:[%s1019_s24 + $0x158] sm:$0xff]  ;;  %v539_v44 = vld [vmem:[%s1019_s24 + $0x160] sm:$0xff] }
  0x74   : > { %665 = vst [vmem:[%s1024_s29 + $0x150] sm:$0xff] %v537_v42  ;;  %666 = vst [vmem:[%s1024_s29 + $0x158] sm:$0xff] %v538_v43  ;;  %v540_v45 = vld [vmem:[%s1019_s24 + $0x168] sm:$0xff]  ;;  %v541_v46 = vld [vmem:[%s1019_s24 + $0x170] sm:$0xff] }
  0x75   : > { %667 = vst [vmem:[%s1024_s29 + $0x160] sm:$0xff] %v539_v44  ;;  %v542_v47 = vld [vmem:[%s1019_s24 + $0x178] sm:$0xff]  ;;  %668 = vst [vmem:[%s1024_s29 + $0x168] sm:$0xff] %v540_v45  ;;  %v543_v48 = vld [vmem:[%s1019_s24 + $0x180] sm:$0xff] }
  0x76   : > { %669 = vst [vmem:[%s1024_s29 + $0x170] sm:$0xff] %v541_v46  ;;  %670 = vst [vmem:[%s1024_s29 + $0x178] sm:$0xff] %v542_v47  ;;  %v544_v49 = vld [vmem:[%s1019_s24 + $0x188] sm:$0xff]  ;;  %v545_v50 = vld [vmem:[%s1019_s24 + $0x190] sm:$0xff] }
  0x77   : > { %671 = vst [vmem:[%s1024_s29 + $0x180] sm:$0xff] %v543_v48  ;;  %672 = vst [vmem:[%s1024_s29 + $0x188] sm:$0xff] %v544_v49  ;;  %v546_v51 = vld [vmem:[%s1019_s24 + $0x198] sm:$0xff]  ;;  %v547_v52 = vld [vmem:[%s1019_s24 + $0x1a0] sm:$0xff] }
  0x78   : > { %673 = vst [vmem:[%s1024_s29 + $0x190] sm:$0xff] %v545_v50  ;;  %v548_v53 = vld [vmem:[%s1019_s24 + $0x1a8] sm:$0xff]  ;;  %674 = vst [vmem:[%s1024_s29 + $0x198] sm:$0xff] %v546_v51  ;;  %v549_v54 = vld [vmem:[%s1019_s24 + $0x1b0] sm:$0xff] }
  0x79   : > { %675 = vst [vmem:[%s1024_s29 + $0x1a0] sm:$0xff] %v547_v52  ;;  %676 = vst [vmem:[%s1024_s29 + $0x1a8] sm:$0xff] %v548_v53  ;;  %v550_v55 = vld [vmem:[%s1019_s24 + $0x1b8] sm:$0xff]  ;;  %v551_v56 = vld [vmem:[%s1019_s24 + $0x1c0] sm:$0xff] }
  0x7a   : > { %677 = vst [vmem:[%s1024_s29 + $0x1b0] sm:$0xff] %v549_v54  ;;  %678 = vst [vmem:[%s1024_s29 + $0x1b8] sm:$0xff] %v550_v55  ;;  %v552_v57 = vld [vmem:[%s1019_s24 + $0x1c8] sm:$0xff]  ;;  %v553_v58 = vld [vmem:[%s1019_s24 + $0x1d0] sm:$0xff] }
  0x7b   : > { %679 = vst [vmem:[%s1024_s29 + $0x1c0] sm:$0xff] %v551_v56  ;;  %v554_v59 = vld [vmem:[%s1019_s24 + $0x1d8] sm:$0xff]  ;;  %680 = vst [vmem:[%s1024_s29 + $0x1c8] sm:$0xff] %v552_v57  ;;  %v555_v60 = vld [vmem:[%s1019_s24 + $0x1e0] sm:$0xff] }
  0x7c   : > { %681 = vst [vmem:[%s1024_s29 + $0x1d0] sm:$0xff] %v553_v58  ;;  %682 = vst [vmem:[%s1024_s29 + $0x1d8] sm:$0xff] %v554_v59  ;;  %v556_v61 = vld [vmem:[%s1019_s24 + $0x1e8] sm:$0xff]  ;;  %v557_v62 = vld [vmem:[%s1019_s24 + $0x1f0] sm:$0xff] }
  0x7d   : > { %683 = vst [vmem:[%s1024_s29 + $0x1e0] sm:$0xff] %v555_v60  ;;  %684 = vst [vmem:[%s1024_s29 + $0x1e8] sm:$0xff] %v556_v61  ;;  %v558_v63 = vld [vmem:[%s1019_s24 + $0x1f8] sm:$0xff]  ;;  %v559_v0 = vld [vmem:[%s1019_s24 + $0x200] sm:$0xff] }
  0x7e   : > { %685 = vst [vmem:[%s1024_s29 + $0x1f0] sm:$0xff] %v557_v62  ;;  %v560_v1 = vld [vmem:[%s1019_s24 + $0x208] sm:$0xff]  ;;  %686 = vst [vmem:[%s1024_s29 + $0x1f8] sm:$0xff] %v558_v63  ;;  %v561_v2 = vld [vmem:[%s1019_s24 + $0x210] sm:$0xff] }
  0x7f   : > { %687 = vst [vmem:[%s1024_s29 + $0x200] sm:$0xff] %v559_v0  ;;  %688 = vst [vmem:[%s1024_s29 + $0x208] sm:$0xff] %v560_v1  ;;  %v562_v3 = vld [vmem:[%s1019_s24 + $0x218] sm:$0xff]  ;;  %v563_v4 = vld [vmem:[%s1019_s24 + $0x220] sm:$0xff] }
  0x80   : > { %689 = vst [vmem:[%s1024_s29 + $0x210] sm:$0xff] %v561_v2  ;;  %690 = vst [vmem:[%s1024_s29 + $0x218] sm:$0xff] %v562_v3  ;;  %v564_v5 = vld [vmem:[%s1019_s24 + $0x228] sm:$0xff]  ;;  %v565_v6 = vld [vmem:[%s1019_s24 + $0x230] sm:$0xff] }
  0x81   : > { %691 = vst [vmem:[%s1024_s29 + $0x220] sm:$0xff] %v563_v4  ;;  %v566_v7 = vld [vmem:[%s1019_s24 + $0x238] sm:$0xff]  ;;  %692 = vst [vmem:[%s1024_s29 + $0x228] sm:$0xff] %v564_v5  ;;  %v567_v8 = vld [vmem:[%s1019_s24 + $0x240] sm:$0xff] }
  0x82   : > { %693 = vst [vmem:[%s1024_s29 + $0x230] sm:$0xff] %v565_v6  ;;  %694 = vst [vmem:[%s1024_s29 + $0x238] sm:$0xff] %v566_v7  ;;  %v568_v9 = vld [vmem:[%s1019_s24 + $0x248] sm:$0xff]  ;;  %v569_v10 = vld [vmem:[%s1019_s24 + $0x250] sm:$0xff] }
  0x83   : > { %695 = vst [vmem:[%s1024_s29 + $0x240] sm:$0xff] %v567_v8  ;;  %696 = vst [vmem:[%s1024_s29 + $0x248] sm:$0xff] %v568_v9  ;;  %v570_v11 = vld [vmem:[%s1019_s24 + $0x258] sm:$0xff]  ;;  %v571_v12 = vld [vmem:[%s1019_s24 + $0x260] sm:$0xff] }
  0x84   : > { %697 = vst [vmem:[%s1024_s29 + $0x250] sm:$0xff] %v569_v10  ;;  %v572_v13 = vld [vmem:[%s1019_s24 + $0x268] sm:$0xff]  ;;  %698 = vst [vmem:[%s1024_s29 + $0x258] sm:$0xff] %v570_v11  ;;  %v573_v14 = vld [vmem:[%s1019_s24 + $0x270] sm:$0xff] }
  0x85   : > { %699 = vst [vmem:[%s1024_s29 + $0x260] sm:$0xff] %v571_v12  ;;  %700 = vst [vmem:[%s1024_s29 + $0x268] sm:$0xff] %v572_v13  ;;  %v574_v15 = vld [vmem:[%s1019_s24 + $0x278] sm:$0xff]  ;;  %v575_v16 = vld [vmem:[%s1019_s24 + $0x280] sm:$0xff] }
  0x86   : > { %701 = vst [vmem:[%s1024_s29 + $0x270] sm:$0xff] %v573_v14  ;;  %702 = vst [vmem:[%s1024_s29 + $0x278] sm:$0xff] %v574_v15  ;;  %v576_v17 = vld [vmem:[%s1019_s24 + $0x288] sm:$0xff]  ;;  %v577_v18 = vld [vmem:[%s1019_s24 + $0x290] sm:$0xff] }
  0x87   : > { %703 = vst [vmem:[%s1024_s29 + $0x280] sm:$0xff] %v575_v16  ;;  %v578_v19 = vld [vmem:[%s1019_s24 + $0x298] sm:$0xff]  ;;  %704 = vst [vmem:[%s1024_s29 + $0x288] sm:$0xff] %v576_v17  ;;  %v579_v20 = vld [vmem:[%s1019_s24 + $0x2a0] sm:$0xff] }
  0x88   : > { %705 = vst [vmem:[%s1024_s29 + $0x290] sm:$0xff] %v577_v18  ;;  %706 = vst [vmem:[%s1024_s29 + $0x298] sm:$0xff] %v578_v19  ;;  %v580_v21 = vld [vmem:[%s1019_s24 + $0x2a8] sm:$0xff]  ;;  %v581_v22 = vld [vmem:[%s1019_s24 + $0x2b0] sm:$0xff] }
  0x89   : > { %707 = vst [vmem:[%s1024_s29 + $0x2a0] sm:$0xff] %v579_v20  ;;  %708 = vst [vmem:[%s1024_s29 + $0x2a8] sm:$0xff] %v580_v21  ;;  %v582_v23 = vld [vmem:[%s1019_s24 + $0x2b8] sm:$0xff]  ;;  %v583_v24 = vld [vmem:[%s1019_s24 + $0x2c0] sm:$0xff] }
  0x8a   : > { %709 = vst [vmem:[%s1024_s29 + $0x2b0] sm:$0xff] %v581_v22  ;;  %v584_v25 = vld [vmem:[%s1019_s24 + $0x2c8] sm:$0xff]  ;;  %710 = vst [vmem:[%s1024_s29 + $0x2b8] sm:$0xff] %v582_v23  ;;  %v585_v26 = vld [vmem:[%s1019_s24 + $0x2d0] sm:$0xff] }
  0x8b   : > { %711 = vst [vmem:[%s1024_s29 + $0x2c0] sm:$0xff] %v583_v24  ;;  %712 = vst [vmem:[%s1024_s29 + $0x2c8] sm:$0xff] %v584_v25  ;;  %v586_v27 = vld [vmem:[%s1019_s24 + $0x2d8] sm:$0xff]  ;;  %v587_v28 = vld [vmem:[%s1019_s24 + $0x2e0] sm:$0xff] }
  0x8c   : > { %713 = vst [vmem:[%s1024_s29 + $0x2d0] sm:$0xff] %v585_v26  ;;  %714 = vst [vmem:[%s1024_s29 + $0x2d8] sm:$0xff] %v586_v27  ;;  %v588_v29 = vld [vmem:[%s1019_s24 + $0x2e8] sm:$0xff]  ;;  %v589_v30 = vld [vmem:[%s1019_s24 + $0x2f0] sm:$0xff] }
  0x8d   : > { %715 = vst [vmem:[%s1024_s29 + $0x2e0] sm:$0xff] %v587_v28  ;;  %v590_v31 = vld [vmem:[%s1019_s24 + $0x2f8] sm:$0xff]  ;;  %716 = vst [vmem:[%s1024_s29 + $0x2e8] sm:$0xff] %v588_v29  ;;  %v591_v32 = vld [vmem:[%s1019_s24 + $0x300] sm:$0xff] }
  0x8e   : > { %717 = vst [vmem:[%s1024_s29 + $0x2f0] sm:$0xff] %v589_v30  ;;  %718 = vst [vmem:[%s1024_s29 + $0x2f8] sm:$0xff] %v590_v31  ;;  %v592_v33 = vld [vmem:[%s1019_s24 + $0x308] sm:$0xff]  ;;  %v593_v34 = vld [vmem:[%s1019_s24 + $0x310] sm:$0xff] }
  0x8f   : > { %719 = vst [vmem:[%s1024_s29 + $0x300] sm:$0xff] %v591_v32  ;;  %720 = vst [vmem:[%s1024_s29 + $0x308] sm:$0xff] %v592_v33  ;;  %v594_v35 = vld [vmem:[%s1019_s24 + $0x318] sm:$0xff]  ;;  %v595_v36 = vld [vmem:[%s1019_s24 + $0x320] sm:$0xff] }
  0x90   : > { %721 = vst [vmem:[%s1024_s29 + $0x310] sm:$0xff] %v593_v34  ;;  %v596_v37 = vld [vmem:[%s1019_s24 + $0x328] sm:$0xff]  ;;  %722 = vst [vmem:[%s1024_s29 + $0x318] sm:$0xff] %v594_v35  ;;  %v597_v38 = vld [vmem:[%s1019_s24 + $0x330] sm:$0xff] }
  0x91   : > { %723 = vst [vmem:[%s1024_s29 + $0x320] sm:$0xff] %v595_v36  ;;  %724 = vst [vmem:[%s1024_s29 + $0x328] sm:$0xff] %v596_v37  ;;  %v598_v39 = vld [vmem:[%s1019_s24 + $0x338] sm:$0xff]  ;;  %v599_v40 = vld [vmem:[%s1019_s24 + $0x340] sm:$0xff] }
  0x92   : > { %725 = vst [vmem:[%s1024_s29 + $0x330] sm:$0xff] %v597_v38  ;;  %726 = vst [vmem:[%s1024_s29 + $0x338] sm:$0xff] %v598_v39  ;;  %v600_v41 = vld [vmem:[%s1019_s24 + $0x348] sm:$0xff]  ;;  %v601_v42 = vld [vmem:[%s1019_s24 + $0x350] sm:$0xff] }
  0x93   : > { %727 = vst [vmem:[%s1024_s29 + $0x340] sm:$0xff] %v599_v40  ;;  %v602_v43 = vld [vmem:[%s1019_s24 + $0x358] sm:$0xff]  ;;  %728 = vst [vmem:[%s1024_s29 + $0x348] sm:$0xff] %v600_v41  ;;  %v603_v44 = vld [vmem:[%s1019_s24 + $0x360] sm:$0xff] }
  0x94   : > { %729 = vst [vmem:[%s1024_s29 + $0x350] sm:$0xff] %v601_v42  ;;  %730 = vst [vmem:[%s1024_s29 + $0x358] sm:$0xff] %v602_v43  ;;  %v604_v45 = vld [vmem:[%s1019_s24 + $0x368] sm:$0xff]  ;;  %v605_v46 = vld [vmem:[%s1019_s24 + $0x370] sm:$0xff] }
  0x95   : > { %731 = vst [vmem:[%s1024_s29 + $0x360] sm:$0xff] %v603_v44  ;;  %732 = vst [vmem:[%s1024_s29 + $0x368] sm:$0xff] %v604_v45  ;;  %v606_v47 = vld [vmem:[%s1019_s24 + $0x378] sm:$0xff]  ;;  %v607_v48 = vld [vmem:[%s1019_s24 + $0x380] sm:$0xff] }
  0x96   : > { %733 = vst [vmem:[%s1024_s29 + $0x370] sm:$0xff] %v605_v46  ;;  %v608_v49 = vld [vmem:[%s1019_s24 + $0x388] sm:$0xff]  ;;  %734 = vst [vmem:[%s1024_s29 + $0x378] sm:$0xff] %v606_v47  ;;  %v609_v50 = vld [vmem:[%s1019_s24 + $0x390] sm:$0xff] }
  0x97   : > { %735 = vst [vmem:[%s1024_s29 + $0x380] sm:$0xff] %v607_v48  ;;  %736 = vst [vmem:[%s1024_s29 + $0x388] sm:$0xff] %v608_v49  ;;  %v610_v51 = vld [vmem:[%s1019_s24 + $0x398] sm:$0xff]  ;;  %v611_v52 = vld [vmem:[%s1019_s24 + $0x3a0] sm:$0xff] }
  0x98   : > { %737 = vst [vmem:[%s1024_s29 + $0x390] sm:$0xff] %v609_v50  ;;  %738 = vst [vmem:[%s1024_s29 + $0x398] sm:$0xff] %v610_v51  ;;  %v612_v53 = vld [vmem:[%s1019_s24 + $0x3a8] sm:$0xff]  ;;  %v613_v54 = vld [vmem:[%s1019_s24 + $0x3b0] sm:$0xff] }
  0x99   : > { %739 = vst [vmem:[%s1024_s29 + $0x3a0] sm:$0xff] %v611_v52  ;;  %v614_v55 = vld [vmem:[%s1019_s24 + $0x3b8] sm:$0xff]  ;;  %740 = vst [vmem:[%s1024_s29 + $0x3a8] sm:$0xff] %v612_v53  ;;  %v615_v56 = vld [vmem:[%s1019_s24 + $0x3c0] sm:$0xff] }
  0x9a   : > { %741 = vst [vmem:[%s1024_s29 + $0x3b0] sm:$0xff] %v613_v54  ;;  %742 = vst [vmem:[%s1024_s29 + $0x3b8] sm:$0xff] %v614_v55  ;;  %v616_v57 = vld [vmem:[%s1019_s24 + $0x3c8] sm:$0xff]  ;;  %v617_v58 = vld [vmem:[%s1019_s24 + $0x3d0] sm:$0xff] }
  0x9b   : > { %743 = vst [vmem:[%s1024_s29 + $0x3c0] sm:$0xff] %v615_v56  ;;  %744 = vst [vmem:[%s1024_s29 + $0x3c8] sm:$0xff] %v616_v57  ;;  %v618_v59 = vld [vmem:[%s1019_s24 + $0x3d8] sm:$0xff]  ;;  %v619_v60 = vld [vmem:[%s1019_s24 + $0x3e0] sm:$0xff] }
  0x9c   : > { %745 = vst [vmem:[%s1024_s29 + $0x3d0] sm:$0xff] %v617_v58  ;;  %v620_v61 = vld [vmem:[%s1019_s24 + $0x3e8] sm:$0xff]  ;;  %746 = vst [vmem:[%s1024_s29 + $0x3d8] sm:$0xff] %v618_v59  ;;  %v621_v62 = vld [vmem:[%s1019_s24 + $0x3f0] sm:$0xff] }
  0x9d   : > { %747 = vst [vmem:[%s1024_s29 + $0x3e0] sm:$0xff] %v619_v60  ;;  %748 = vst [vmem:[%s1024_s29 + $0x3e8] sm:$0xff] %v620_v61  ;;  %v622_v63 = vld [vmem:[%s1019_s24 + $0x3f8] sm:$0xff] }
  0x9e   : > { %749 = vst [vmem:[%s1024_s29 + $0x3f0] sm:$0xff] %v621_v62  ;;  %750 = vst [vmem:[%s1024_s29 + $0x3f8] sm:$0xff] %v622_v63 }
  0x9f PF: > { %s12_s13 = sadd.s32 1, %s961_s13   ;;  %s1558_s9 = smov %s953_s11 }
  0xa0   : > { %p9_p9 = scmp.ge.s32.totalorder %s12_s13, 6   ;;  %s1559_s10 = smov %s957_s12 }
  0xa1   : > { %s1560_s11 = smov %s1563_s14  ;;  %s1561_s12 = smov %s1567_s15 }
  0xa2   :  { %11 = sbr.rel (!%p9_p9) target bundleno = 3 (0x3), region = 69 }

</bundles_post_ra>
